<compile_context>
chip_gen: v5e
topology: v5e:2x2
jax: 0.10.0
libtpu: 0.0.40
codegen_flags: <defaults>
</compile_context>

<pallas_src>
import jax
import jax.numpy as jnp
from jax.experimental import pallas as pl
from jax.experimental.pallas import tpu as pltpu


def hybrid_embed_kernel(patch_ref, w_ref, b_ref, out_ref):
    # patch_ref: (TP, Kp)  row tile of im2col patches (batch folded into rows)
    # w_ref    : (Kp, E)   fused weight = W_backbone @ W_proj     (grid-invariant)
    # b_ref    : (1,  E)   fused bias   = b_backbone @ W_proj + b_proj, f32
    acc = jnp.dot(patch_ref[...], w_ref[...], preferred_element_type=jnp.float32)
    acc = acc + b_ref[...]                       # bias add in f32
    out_ref[...] = acc.astype(out_ref.dtype)     # single cast at the final store


def _round_up(x, m):
    return ((x + m - 1) // m) * m


def _sublane(dtype):
    # f32/i32 -> 8, bf16/f16 -> 16, int8/fp8 -> 32
    return 8 * (4 // jnp.dtype(dtype).itemsize)


def _choose_row_tile(total_rows, kp, e, in_dtype, out_dtype, sublane,
                     vmem_budget, max_row_tile):
    """Largest row tile whose (double-buffered) in/out tiles fit the VMEM
    budget, padded the way VMEM actually pads them, and capped so the grid has
    at least 2 steps (v7x megacore)."""
    in_item = jnp.dtype(in_dtype).itemsize
    out_item = jnp.dtype(out_dtype).itemsize
    kp_lanes = _round_up(kp, 128)                 # input rows occupy full 128-lane tiles
    e_lanes = _round_up(e, 128)
    per_row = 2 * (kp_lanes * in_item + e_lanes * out_item)        # dbl-buffered in + out
    weights = 2 * (_round_up(kp, sublane) * e_lanes * in_item      # dbl-buffered weight
                   + e_lanes * 4)                                  # + f32 bias
    tp = max(sublane, (vmem_budget - weights) // max(per_row, 1))
    tp = (tp // sublane) * sublane
    # Guarantee >= 2 grid steps so both v7x TensorCores get work.
    half = (((total_rows + 1) // 2) // sublane) * sublane
    tp = min(tp, max_row_tile, max(sublane, half))
    return max(sublane, tp)


def hybrid_embed(x_nchw, w_bb, b_bb, w_pr, b_pr, *, kernel=2, stride=2,
                 out_dtype=None, compute_dtype=None, row_tile=None,
                 max_row_tile=1024, vmem_limit_bytes=32 * 1024 * 1024):
    """x_nchw: (B, C_in, H, W). Returns (B, num_patches, embed_dim).

    out_dtype     : storage dtype of the result (default: x dtype). Use bf16
                    when the surrounding model is bf16 -- biggest perf lever.
    compute_dtype : operand dtype fed to the MXU (default: x dtype). bf16
                    halves operand DMA on v6e/v7x; accumulation stays f32.
    max_row_tile  : 1024 is v7x-safe; v5e/v6e (128 MiB VMEM) may use 2048.
    """
    B, C_in, H, W = x_nchw.shape
    assert kernel == stride, "patchify backbone requires kernel == stride"
    Hf, Wf = H // stride, W // stride
    P = Hf * Wf                        # num_patches
    Kp = C_in * kernel * kernel        # im2col patch length
    Cf = w_bb.shape[1]                 # backbone feature_dim
    E = w_pr.shape[1]                  # embed_dim
    assert w_bb.shape[0] == Kp and w_pr.shape[0] == Cf

    out_dtype = x_nchw.dtype if out_dtype is None else jnp.dtype(out_dtype)
    compute_dtype = x_nchw.dtype if compute_dtype is None else jnp.dtype(compute_dtype)
    sublane = _sublane(compute_dtype)

    # --- pre-compose the two matmuls (valid: the patchify backbone is linear) --
    #   out = (patch @ W_bb + b_bb) @ W_pr + b_pr
    #       =  patch @ (W_bb @ W_pr) + (b_bb @ W_pr + b_pr)
    w_fused = jnp.dot(w_bb.astype(jnp.float32), w_pr.astype(jnp.float32),
                      preferred_element_type=jnp.float32)                    # (Kp, E)
    b_fused = (jnp.dot(b_bb.astype(jnp.float32), w_pr.astype(jnp.float32),
                       preferred_element_type=jnp.float32)
               + b_pr.astype(jnp.float32))                                   # (1, E) f32

    # --- NCHW -> im2col patches with a SINGLE transpose (fusable producer) ----
    # (b, c, hf*k+kh, wf*k+kw) -> (b, hf, wf, c, kh, kw) -> (B*P, Kp)
    patches = x_nchw.reshape(B, C_in, Hf, kernel, Wf, kernel)
    patches = jnp.transpose(patches, (0, 2, 4, 1, 3, 5))
    patches = patches.reshape(B * P, Kp)

    # --- pad Kp to the compute-dtype sublane multiple (unmasked MXU feed) -----
    Kp_pad = _round_up(Kp, sublane)
    if Kp_pad != Kp:
        patches = jnp.pad(patches, ((0, 0), (0, Kp_pad - Kp)))
        w_fused = jnp.pad(w_fused, ((0, Kp_pad - Kp), (0, 0)))

    patches = patches.astype(compute_dtype)
    w_fused = w_fused.astype(compute_dtype)

    total_rows = B * P
    TP = row_tile if row_tile is not None else _choose_row_tile(
        total_rows, Kp_pad, E, compute_dtype, out_dtype, sublane,
        vmem_budget=24 * 1024 * 1024, max_row_tile=max_row_tile)
    grid = (pl.cdiv(total_rows, TP),)

    # TODO(synk): when pushing TP toward the v7x VMEM limit, single-buffer the
    #             grid-invariant weight/bias blocks (pipeline_mode=pl.Buffered(1)).
    out_flat = pl.pallas_call(
        hybrid_embed_kernel,
        out_shape=jax.ShapeDtypeStruct((total_rows, E), out_dtype),
        grid=grid,
        in_specs=[
            pl.BlockSpec((TP, Kp_pad), lambda i: (i, 0)),   # row tile of patches
            pl.BlockSpec((Kp_pad, E), lambda i: (0, 0)),    # fused weight (grid-invariant)
            pl.BlockSpec((1, E), lambda i: (0, 0)),         # fused bias   (grid-invariant)
        ],
        out_specs=pl.BlockSpec((TP, E), lambda i: (i, 0)),  # lane-dense when E % 128 == 0
        compiler_params=pltpu.CompilerParams(
            dimension_semantics=("parallel",),              # shard row tiles across v7x TCs
            vmem_limit_bytes=vmem_limit_bytes,              # within v7x's 64 MiB physical VMEM
            allow_input_fusion=[True, False, False],        # fuse im2col transpose into input DMA
        ),
    )(patches, w_fused, b_fused)

    return out_flat.reshape(B, P, E)


def reference(x_nchw, w_bb, b_bb, w_pr, b_pr, *, kernel=2, stride=2):
    """Pure-JAX reference mirroring the PyTorch forward semantics (two steps)."""
    B, C_in, H, W = x_nchw.shape
    Hf, Wf = H // stride, W // stride
    Kp = C_in * kernel * kernel
    patches = x_nchw.reshape(B, C_in, Hf, kernel, Wf, kernel)
    patches = jnp.transpose(patches, (0, 2, 4, 1, 3, 5)).reshape(B, Hf * Wf, Kp)
    feat = patches @ w_bb + b_bb       # Conv2d(k=2,s=2) then flatten(2).transpose(1,2)
    return feat @ w_pr + b_pr          # nn.Linear(feature_dim, embed_dim)


if __name__ == "__main__":
    # Small shapes consistent with the module.
    B, C_in, H, W = 2, 4, 16, 16       # input image (NCHW)
    kernel = stride = 2
    feature_dim = 32                   # backbone output channels
    embed_dim = 128                    # multiple of 128 -> lane-dense stores (module default 768 also is)
    Kp = C_in * kernel * kernel

    key = jax.random.PRNGKey(0)
    kx, k1, k2, k3, k4 = jax.random.split(key, 5)
    x = jax.random.normal(kx, (B, C_in, H, W), dtype=jnp.float32)
    w_bb = jax.random.normal(k1, (Kp, feature_dim), dtype=jnp.float32) * 0.05
    b_bb = jax.random.normal(k2, (1, feature_dim), dtype=jnp.float32) * 0.05
    w_pr = jax.random.normal(k3, (feature_dim, embed_dim), dtype=jnp.float32) * 0.05
    b_pr = jax.random.normal(k4, (1, embed_dim), dtype=jnp.float32) * 0.05

    ref = reference(x, w_bb, b_bb, w_pr, b_pr, kernel=kernel, stride=stride)
    P = (H // stride) * (W // stride)

    # 1) Default path: f32 in/out, auto row tiling (grid >= 2 steps).
    out = jax.block_until_ready(
        hybrid_embed(x, w_bb, b_bb, w_pr, b_pr, kernel=kernel, stride=stride))
    assert out.shape == (B, P, embed_dim)
    assert jnp.allclose(out, ref, atol=1e-4, rtol=1e-4)

    # 2) Non-divisible row tile (partial last block, masked store path).
    out2 = jax.block_until_ready(
        hybrid_embed(x, w_bb, b_bb, w_pr, b_pr, kernel=kernel, stride=stride, row_tile=48))
    assert jnp.allclose(out2, ref, atol=1e-4, rtol=1e-4)

    # 3) bf16 operands + bf16 store (the HBM-writeback-bound fast path on v6e/v7x).
    out3 = jax.block_until_ready(
        hybrid_embed(x, w_bb, b_bb, w_pr, b_pr, kernel=kernel, stride=stride,
                     out_dtype=jnp.bfloat16, compute_dtype=jnp.bfloat16))
    assert out3.dtype == jnp.bfloat16
    assert jnp.allclose(out3.astype(jnp.float32), ref, atol=2e-2, rtol=2e-2)

    # 4) Kp not a multiple of the sublane (C_in=3 -> Kp=12): exercises zero-padding.
    C_in2 = 3
    Kp2 = C_in2 * kernel * kernel
    kx2, k5, k6 = jax.random.split(jax.random.PRNGKey(1), 3)
    x2 = jax.random.normal(kx2, (B, C_in2, H, W), dtype=jnp.float32)
    w_bb2 = jax.random.normal(k5, (Kp2, feature_dim), dtype=jnp.float32) * 0.05
    b_bb2 = jax.random.normal(k6, (1, feature_dim), dtype=jnp.float32) * 0.05
    ref2 = reference(x2, w_bb2, b_bb2, w_pr, b_pr, kernel=kernel, stride=stride)
    out4 = jax.block_until_ready(
        hybrid_embed(x2, w_bb2, b_bb2, w_pr, b_pr, kernel=kernel, stride=stride))
    assert jnp.allclose(out4, ref2, atol=1e-4, rtol=1e-4)

    print("KERNEL_OK")
</pallas_src>

<mosaic_0001>
module attributes {stable_mosaic.version = 11 : i64} {
  func.func @hybrid_embed_kernel(%arg0: i32, %arg1: memref<64x16xf32, #tpu.memory_space<vmem>>, %arg2: memref<16x128xf32, #tpu.memory_space<vmem>>, %arg3: memref<1x128xf32, #tpu.memory_space<vmem>>, %arg4: memref<64x128xf32, #tpu.memory_space<vmem>>) attributes {dimension_semantics = [#tpu.dimension_semantics<parallel>], iteration_bounds = array<i64: 2>, scalar_prefetch = 0 : i64, scratch_operands = 0 : i64, tpu.core_type = #tpu.core_type<tc>, window_params = [{transform_indices = @transform_0, window_bounds = array<i64: 64, 16>}, {pipeline_mode = #tpu.pipeline_mode<synchronous>, transform_indices = @transform_1, window_bounds = array<i64: 16, 128>}, {pipeline_mode = #tpu.pipeline_mode<synchronous>, transform_indices = @transform_2, window_bounds = array<i64: 1, 128>}, {transform_indices = @transform_3, window_bounds = array<i64: 64, 128>}]} {
    %c0 = arith.constant 0 : index
    %c0_0 = arith.constant 0 : index
    %0 = vector.load %arg1[%c0, %c0_0] : memref<64x16xf32, #tpu.memory_space<vmem>>, vector<64x16xf32>
    %c0_1 = arith.constant 0 : index
    %c0_2 = arith.constant 0 : index
    %1 = vector.load %arg2[%c0_1, %c0_2] : memref<16x128xf32, #tpu.memory_space<vmem>>, vector<16x128xf32>
    %cst = arith.constant dense<0.000000e+00> : vector<64x128xf32>
    %2 = tpu.matmul %0, %1, %cst {dimension_numbers = #tpu.dot_dimension_numbers<[1], [0], [0], [1], [0, 0, 1, 1], [], []>} : vector<64x16xf32>, vector<16x128xf32>, vector<64x128xf32> -> vector<64x128xf32>
    %c0_3 = arith.constant 0 : index
    %c0_4 = arith.constant 0 : index
    %3 = vector.load %arg3[%c0_3, %c0_4] : memref<1x128xf32, #tpu.memory_space<vmem>>, vector<1x128xf32>
    %4 = vector.broadcast %3 : vector<1x128xf32> to vector<64x128xf32>
    %5 = arith.addf %2, %4 : vector<64x128xf32>
    %c0_5 = arith.constant 0 : index
    %c0_6 = arith.constant 0 : index
    %6 = vector.load %arg4[%c0_5, %c0_6] : memref<64x128xf32, #tpu.memory_space<vmem>>, vector<64x128xf32>
    tpu.vector_store %arg4[%c0_5, %c0_6], %5 {strides = array<i32>} : memref<64x128xf32, #tpu.memory_space<vmem>>, vector<64x128xf32>,
    return
  }
  func.func @transform_0(%arg0: i32) -> (i32, i32) {
    %c0_i32 = arith.constant 0 : i32
    %c0_i32_0 = arith.constant 0 : i32
    return %arg0, %c0_i32 : i32, i32
  }
  func.func @transform_1(%arg0: i32) -> (i32, i32) {
    %c0_i32 = arith.constant 0 : i32
    %c0_i32_0 = arith.constant 0 : i32
    %c0_i32_1 = arith.constant 0 : i32
    return %c0_i32, %c0_i32_0 : i32, i32
  }
  func.func @transform_2(%arg0: i32) -> (i32, i32) {
    %c0_i32 = arith.constant 0 : i32
    %c0_i32_0 = arith.constant 0 : i32
    %c0_i32_1 = arith.constant 0 : i32
    return %c0_i32, %c0_i32_0 : i32, i32
  }
  func.func @transform_3(%arg0: i32) -> (i32, i32) {
    %c0_i32 = arith.constant 0 : i32
    %c0_i32_0 = arith.constant 0 : i32
    return %arg0, %c0_i32 : i32, i32
  }
}

</mosaic_0001>

<bundles_post_ra>
// kernel: tpu_custom_call.1
= control target key start
LH: loop header
LB: loop body
LE: loop exit
PB: predicated region body
PF: predicated region fallthrough
CT: control target
= control target key end

     0   :  { %8 = vsyncpa [#allocation3], 0  ;;  %s598_s0 = inlined_call_operand.vmem [shape: f32[128,16], index: 0, kind: input, shape index: {}]   ;;  %s599_s1 = inlined_call_operand.vmem [shape: f32[16,128], index: 1, kind: input, shape index: {}]   ;;  %s600_s2 = inlined_call_operand.vmem [shape: f32[1,128], index: 2, kind: input, shape index: {}]   ;;  %s601_s3 = inlined_call_operand.hbm [shape: f32[128,128], index: 3, kind: output, shape index: {}]  }
   0x1   :  { %10 = vsyncpa [#allocation3 + $0x1], 0  ;;  %s493_s12 = smov 0   ;;  %s495_s13 = smov 0  }
   0x2   :  { %s497_s14 = smov 0   ;;  %s499_s15 = smov 0  }
   0x3 LB: > { %s514_s16 = sadd.s32 4294967295, %s469_s15   ;;  %s338_s17 = sadd.s32 4294967294, %s469_s15   ;;  %s469_s15 = sphi %s499_s15, %s607_s15   ;;  %s465_s14 = sphi %s497_s14, %s606_s14   ;;  %s461_s13 = sphi %s495_s13, %s605_s13   ;;  %s457_s12 = sphi %s493_s12, %s604_s12  }
   0x4   : > { %s518_s18 = sadd.s32 1, %s469_s15   ;;  %s91_s19 = sadd.s32 1, %s465_s14 }
   0x5   : > { %s88_s20 = ssub.s32 %s469_s15, %s518_s18  ;;  %p101_p0 = scmp.ne.s32.totalorder %s465_s14, %s461_s13 }
   0x6   : > { %p89_p1 = scmp.eq.s32.totalorder %s88_s20, 0  ;;  %p102_p2 = scmp.eq.s32.totalorder %s514_s16, 1 }
   0x7   : > { %p107_p3 = scmp.ne.s32.totalorder %s461_s13, %s457_s12  ;;  %p108_p4 = scmp.eq.s32.totalorder %s338_s17, 1 }
   0x8   : > { %s529_s21 = scalar_select %p89_p1, %s465_s14, %s91_s19  }
   0x9   : > { %p531_p5 = por %p102_p2, %p101_p0  ;;  %p535_p6 = por %p108_p4, %p107_p3 }
   0xa   : > { %p341_p7 = scmp.ge.s32.totalorder %s469_s15, 1  ;;  %p141_p8 = scmp.lt.s32.totalorder %s469_s15, 3 }
   0xc   : > { %p142_p9 = pnand %p341_p7, %p141_p8 }
   0xd   : > { %s343_s28 = sshll.u32 (!%p142_p9), %s514_s16, 3  ;;  %s162_s6 = sand.u32 (!%p142_p9), 1, %s461_s13  }
   0xe   : > { %145 = sbr.rel (%p142_p9) target bundleno = 171 (0xab), region = 32  ;;  %p166_p10 = scmp.lt.s32.totalorder (!%p142_p9), %s343_s28, 15 }
   0xf   : > { %s342_s7 = sshll.u32 (!%p142_p9), %s162_s6, 6  ;;  %s358_s11 = sshll.u32 (!%p142_p9), %s514_s16, 6 }
  0x10   : > { %s164_s10 = scalar_lea.vmem (!%p142_p9), [#allocation2], %s342_s7  ;;  %s272_s20 = scalar_lea.hbm (!%p142_p9), %s601_s3, %s358_s11 }
  0x11   : > { %s273_s24 = sshll.u32 (!%p142_p9), %s164_s10, 4  ;;  %s275_s25 = sshll.u32 (!%p142_p9), %s272_s20, 4  ;;  %s274_s24 = int_to_ptr.vmem [resolvable:$true] %s273_s24  ;;  %s276_s25 = int_to_ptr.hbm [resolvable:$true] %s275_s25 }
  0x12   : > { %s261_s16 = scalar_lea.sflag (!%p142_p9), [#allocation3], %s162_s6  ;;  %s421_s26 = sshra.s32 (!%p142_p9), %s276_s25, 4  ;;  %s422_s26 = int_to_ptr.hbm [resolvable:$true] %s421_s26 }
  0x13   : > { %v181_v0 = vld [vmem:[%s599_s1 + $0x8] sm:$0xff]  ;;  %v180_v1 = vld [vmem:[%s599_s1] sm:$0xff]  ;;  %s609_s28 = smov (!%p166_p10, %s343_s28), 15  ;;  %vm186_vm0 = vcmask 130048   ;;  %s423_s27 = scalar_lea.hbm %s422_s26, 64 }
  0x14   : > { %360 = vmatpush.msra.mxu2 %v181_v0  ;;  %361 = vmatpush.msra.mxu3 %v181_v0  ;;  %s344_s29 = sshll.u32 %s609_s28, 3  ;;  %v406_v10 = vld [vmem:[%s600_s2] ss:$0 sm:$0xff]  ;;  %p424_p11 = scmp.ne.s32.totalorder %s422_s26, %s423_s27 }
  0x15   : > { %225 = vmatpush.msra.mxu0 %v181_v0  ;;  %359 = vmatpush.msra.mxu1 %v181_v0  ;;  %s169_s5 = scalar_lea.vmem %s598_s0, %s344_s29  ;;  %s427_s30 = scalar_lea.hbm %s601_s3, 128 }
  0x16   : > { %363 = vmatpush.msra.mxu2 %v180_v1  ;;  %364 = vmatpush.msra.mxu3 %v180_v1  ;;  %v176_v2 = vld [vmem:[%s169_s5 + $0x20] sm:$0xff]  ;;  %v178_v3 = vld [vmem:[%s169_s5 + $0x30] sm:$0xff]  ;;  %v177_v6 = vld [vmem:[%s169_s5 + $0x28] sm:$0xff]  ;;  %p425_p12 = pnand %p424_p11, %p531_p5  ;;  %p428_p0 = scmp.lt.s32.totalorder %s422_s26, %s601_s3 }
  0x17   : > { %226 = vmatpush.msra.mxu0 %v180_v1  ;;  %362 = vmatpush.msra.mxu1 %v180_v1  ;;  %v172_v4 = vld [vmem:[%s169_s5] sm:$0xff]  ;;  %v174_v5 = vld [vmem:[%s169_s5 + $0x10] sm:$0xff]  ;;  %v179_v7 = vld [vmem:[%s169_s5 + $0x38] sm:$0xff]  ;;  %p429_p1 = scmp.lt.s32.totalorder %s427_s30, %s423_s27 }
  0x18   : > { %349 = vmatmul.msk.f32.vlgmr.msra.gmra.mxu2 %vm186_vm0, %v176_v2  ;;  %351 = vmatmul.msk.f32.vlgmr.msra.gmra.mxu3 %vm186_vm0, %v178_v3  ;;  %v173_v8 = vld [vmem:[%s169_s5 + $0x8] sm:$0xff]  ;;  %v175_v9 = vld [vmem:[%s169_s5 + $0x18] sm:$0xff]  ;;  %p426_p13 = pneg %p425_p12 }
  0x19   : > { %345 = vmatmul.msk.f32.vlgmr.msra.gmra.mxu0 %vm186_vm0, %v172_v4  ;;  %347 = vmatmul.msk.f32.vlgmr.msra.gmra.mxu1 %vm186_vm0, %v174_v5  ;;  %p430_p2 = por %p429_p1, %p428_p0 }
  0x1b   : > { %p431_p3 = pnand %p430_p2, %p426_p13 }
  0x20   : > { %350 = vmatmul.msk.f32.gmra.mxu2 %vm186_vm0, %v177_v6  ;;  %352 = vmatmul.msk.f32.gmra.mxu3 %vm186_vm0, %v179_v7 }
  0x21   : > { %346 = vmatmul.msk.f32.gmra.mxu0 %vm186_vm0, %v173_v8  ;;  %348 = vmatmul.msk.f32.gmra.mxu1 %vm186_vm0, %v175_v9 }
  0x96   : > { %v228_v11 = vpop.f32.mrf.mxu0  ;;  %v234_v12 = vpop.f32.mrf.mxu1 }
  0x97   : > { %v229_v13 = vadd.f32 %v406_v10, %v228_v11  ;;  %v235_v14 = vadd.f32 %v406_v10, %v234_v12 }
  0x99   : > { %252 = vst [vmem:[%s164_s10] sm:$0xff] %v229_v13 }
  0x9a   : > { %254 = vst [vmem:[%s164_s10 + $0x10] sm:$0xff] %v235_v14 }
  0x9b   : > { %v240_v15 = vpop.f32.mrf.mxu2  ;;  %v246_v16 = vpop.f32.mrf.mxu3 }
  0x9c   : > { %v241_v17 = vadd.f32 %v406_v10, %v240_v15  ;;  %v247_v18 = vadd.f32 %v406_v10, %v246_v16 }
  0x9e   : > { %256 = vst [vmem:[%s164_s10 + $0x20] sm:$0xff] %v241_v17  ;;  %v231_v19 = vpop.f32.mrf.mxu0  ;;  %v237_v20 = vpop.f32.mrf.mxu1 }
  0x9f   : > { %258 = vst [vmem:[%s164_s10 + $0x30] sm:$0xff] %v247_v18  ;;  %v232_v21 = vadd.f32 %v406_v10, %v231_v19  ;;  %v238_v22 = vadd.f32 %v406_v10, %v237_v20 }
  0xa1   : > { %253 = vst [vmem:[%s164_s10 + $0x8] sm:$0xff] %v232_v21 }
  0xa2   : > { %255 = vst [vmem:[%s164_s10 + $0x18] sm:$0xff] %v238_v22 }
  0xa3   : > { %v243_v23 = vpop.f32.mrf.mxu2  ;;  %v249_v24 = vpop.f32.mrf.mxu3 }
  0xa4   : > { %v244_v25 = vadd.f32 %v406_v10, %v243_v23  ;;  %v250_v26 = vadd.f32 %v406_v10, %v249_v24 }
  0xa6   : > { %257 = vst [vmem:[%s164_s10 + $0x28] sm:$0xff] %v244_v25 }
  0xa7   : > { %259 = vst [vmem:[%s164_s10 + $0x38] sm:$0xff] %v250_v26 }
  0xa8   : > { %434 = shalt.err (!%p431_p3)
}
  0xa9   : > { %s471_s6 = smov 128   ;;  %s472_s7 = smov 8  }
  0xaa   : > { %365 = dma.vmem_to_hbm [thread:$0]  (%p531_p5), %s274_s24, 1024, %s276_s25, %s261_s16, %s471_s6, %s471_s6, %s472_s7  }
  0xab PF: > { %p371_p4 = scmp.ge.s32.totalorder %s469_s15, 2  ;;  %s290_s8 = sand.u32 1, %s457_s12  }
  0xac   : > { %s291_s9 = scalar_lea.sflag [#allocation3], %s290_s8 }
  0xad   : > { %p368_p7 = pnand %p371_p4, %p535_p6 }
  0xaf   : > { %p369_p8 = pneg %p368_p7 }
  0xb1   : > { %452 = dma.done.wait (%p369_p8), %s291_s9, 1024  }
  0xb2   : > { %454 = vsyncadd (%p369_p8), %s291_s9, 4294966272  ;;  %p13_p9 = scmp.ge.s32.totalorder %s518_s18, 4   ;;  %s604_s12 = smov %s461_s13 }
  0xb3   : > { %s605_s13 = smov %s465_s14  ;;  %s606_s14 = smov %s529_s21 }
  0xb4   : > { %s607_s15 = smov %s518_s18  ;;  %15 = sbr.rel (!%p13_p9) target bundleno = 3 (0x3), region = 67 }
  0xb9   :  { %297 = vsyncpa [#allocation3], 1 }
  0xba   :  { %299 = vsyncpa [#allocation3 + $0x1], 1 }

</bundles_post_ra>
